<compile_context>
chip_gen: v7x
topology: tpu7x:2x2x1
jax: 0.10.0
libtpu: 0.0.40
codegen_flags: <defaults>
</compile_context>

<pallas_src>
import jax
import jax.numpy as jnp
from jax.experimental import pallas as pl
from jax.experimental.pallas import tpu as pltpu


_INV_SQRT2 = 0.7071067811865475244


def _round_up(x, m):
    return ((x + m - 1) // m) * m


def _gelu_exact(h):
    # Exact erf-based GELU == torch.nn.GELU() default.
    return 0.5 * h * (1.0 + jax.lax.erf(h * _INV_SQRT2))


def _make_mlp_kernel(n_chunks):
    """Kernel body; n_chunks is static (closed over)."""

    def kernel(x_ref, w1_ref, b1_ref, w2_ref, b2_ref, o_ref, acc_ref):
        # x_ref:  (tm, Dp_in)                 x dtype (cast in-kernel)
        # w1_ref: (n_chunks, Dp_in, hid_c)    compute dtype, VMEM-resident
        # b1_ref: (n_chunks, 1, hid_c)        f32
        # w2_ref: (n_chunks, hid_c, Dp_out)   compute dtype, VMEM-resident
        # b2_ref: (1, Dp_out)                 f32
        # o_ref:  (tm, Dp_out)                out dtype
        # acc_ref:(tm, Dp_out)                f32 scratch accumulator
        x = x_ref[...].astype(w1_ref.dtype)   # cast on VPU, no extra HBM pass
        acc_ref[...] = jnp.zeros_like(acc_ref)

        def chunk_body(c, carry):
            # fc1 chunk -> GELU -> fc2 chunk, f32 accumulation on the MXU.
            h = jnp.dot(x, w1_ref[c], preferred_element_type=jnp.float32)
            h = _gelu_exact(h + b1_ref[c])
            acc_ref[...] += jnp.dot(h.astype(w2_ref.dtype), w2_ref[c],
                                    preferred_element_type=jnp.float32)
            return carry

        jax.lax.fori_loop(0, n_chunks, chunk_body, 0,
                          unroll=bool(n_chunks <= 4))
        o_ref[...] = (acc_ref[...] + b2_ref[...]).astype(o_ref.dtype)

    return kernel


def prepare_mlp_params(w1, b1, w2, b2, *, compute_dtype=jnp.bfloat16,
                       hid_chunk=512):
    """Pad/cast/lay out the weights once; reuse the result for every forward.

    w1: (D_in, D_hid)  (transposed vs torch nn.Linear's (D_hid, D_in))
    b1: (D_hid,)   w2: (D_hid, D_out)   b2: (D_out,)
    """
    assert hid_chunk % 128 == 0, "hid_chunk must be a multiple of 128"
    compute_dtype = jnp.dtype(compute_dtype)
    D_in, D_hid = w1.shape
    D_out = w2.shape[1]

    Dp_in = _round_up(D_in, 128)
    Dp_out = _round_up(D_out, 128)
    if D_hid <= hid_chunk:
        Dp_hid = _round_up(D_hid, 128)
        hid_chunk = Dp_hid
    else:
        Dp_hid = _round_up(D_hid, hid_chunk)
    n_chunks = Dp_hid // hid_chunk

    def pad2(a, shape):
        a = a.astype(compute_dtype)
        if a.shape == shape:
            return a
        return jnp.zeros(shape, compute_dtype).at[:a.shape[0], :a.shape[1]].set(a)

    # 3-D chunk layout so the kernel indexes chunks along the leading dim
    # (cheap dynamic first-axis indexing; no dynamic lane slicing).
    w1p = pad2(w1, (Dp_in, Dp_hid))
    w1p = w1p.reshape(Dp_in, n_chunks, hid_chunk).transpose(1, 0, 2)
    w2p = pad2(w2, (Dp_hid, Dp_out)).reshape(n_chunks, hid_chunk, Dp_out)
    b1p = jnp.zeros((Dp_hid,), jnp.float32).at[:D_hid].set(
        b1.astype(jnp.float32)).reshape(n_chunks, 1, hid_chunk)
    b2p = jnp.zeros((1, Dp_out), jnp.float32).at[0, :D_out].set(
        b2.astype(jnp.float32))

    dims = dict(D_in=D_in, D_hid=D_hid, D_out=D_out,
                Dp_in=Dp_in, Dp_hid=Dp_hid, Dp_out=Dp_out,
                hid_chunk=hid_chunk, n_chunks=n_chunks,
                compute_dtype=compute_dtype)
    return (w1p, b1p, w2p, b2p), dims


def mlp_pallas_prepared(x, params, dims, *, tm=256, out_dtype=None,
                        vmem_limit_bytes=None):
    """Run the fused MLP with pre-prepared (padded/cast) parameters."""
    w1p, b1p, w2p, b2p = params
    D_in, D_out = dims["D_in"], dims["D_out"]
    Dp_in, Dp_hid, Dp_out = dims["Dp_in"], dims["Dp_hid"], dims["Dp_out"]
    hid_chunk, n_chunks = dims["hid_chunk"], dims["n_chunks"]
    compute_dtype = dims["compute_dtype"]

    B, N, _ = x.shape
    assert x.shape[-1] == D_in, "feature dim mismatch"
    M = B * N
    out_dtype = x.dtype if out_dtype is None else jnp.dtype(out_dtype)

    # Row tile: multiple of 8 sublanes; shrink so small-M calls still give both
    # v7x TensorCores at least one tile each (dimension_semantics "parallel").
    tm = max(8, (min(tm, _round_up(M, 8)) // 8) * 8)
    while tm > 8 and (M + tm - 1) // tm < 2:
        tm = max(8, ((tm // 2) // 8) * 8)
    Mp = _round_up(M, tm)
    grid = (Mp // tm,)

    x_flat = x.reshape(M, D_in)
    if Mp == M and Dp_in == D_in:
        x2d = x_flat                      # zero-copy: no extra HBM pass
    else:
        x2d = jnp.zeros((Mp, Dp_in), x.dtype).at[:M, :D_in].set(x_flat)

    c_size = compute_dtype.itemsize
    x_size = jnp.dtype(x.dtype).itemsize
    o_size = out_dtype.itemsize

    cost = pl.CostEstimate(
        flops=2 * Mp * (Dp_in * Dp_hid + Dp_hid * Dp_out),
        transcendentals=Mp * Dp_hid,
        bytes_accessed=(Mp * Dp_in * x_size
                        + (Dp_in * Dp_hid + Dp_hid * Dp_out) * c_size
                        + Mp * Dp_out * o_size),
    )

    def _vmem_limit(n_weight_bufs):
        if vmem_limit_bytes is not None:
            return int(vmem_limit_bytes)
        need = (n_weight_bufs * ((Dp_in * Dp_hid + Dp_hid * Dp_out) * c_size
                                 + (Dp_hid + Dp_out) * 4)   # weights + biases
                + 2 * tm * Dp_in * x_size                   # x tiles (dbl buf)
                + 2 * tm * Dp_out * o_size                  # out tiles (dbl buf)
                + tm * Dp_out * 4                           # f32 accumulator
                + 6 * tm * hid_chunk * 4                    # h + GELU temps
                + (4 << 20))                                # compiler headroom
        try:
            cap = int(getattr(pltpu.get_tpu_info(), "vmem_capacity_bytes",
                              64 << 20))
        except Exception:
            cap = 64 << 20                                  # v7x per-TC floor
        return int(min(max(need, 16 << 20), int(cap * 0.96)))

    def _run(single_buffer_weights):
        if single_buffer_weights:
            def wspec(shape, imap):
                return pl.BlockSpec(shape, imap, pipeline_mode=pl.Buffered(1))
            n_wbuf = 1
        else:
            def wspec(shape, imap):
                return pl.BlockSpec(shape, imap)
            n_wbuf = 2

        return pl.pallas_call(
            _make_mlp_kernel(n_chunks),
            out_shape=jax.ShapeDtypeStruct((Mp, Dp_out), out_dtype),
            grid_spec=pltpu.PrefetchScalarGridSpec(
                num_scalar_prefetch=0,
                grid=grid,
                in_specs=[
                    # Streamed row tiles of x.
                    pl.BlockSpec((tm, Dp_in), lambda i: (i, 0)),
                    # Constant-index weights/biases: resident in VMEM.
                    wspec((n_chunks, Dp_in, hid_chunk), lambda i: (0, 0, 0)),
                    wspec((n_chunks, 1, hid_chunk), lambda i: (0, 0, 0)),
                    wspec((n_chunks, hid_chunk, Dp_out), lambda i: (0, 0, 0)),
                    wspec((1, Dp_out), lambda i: (0, 0)),
                ],
                out_specs=pl.BlockSpec((tm, Dp_out), lambda i: (i, 0)),
                scratch_shapes=[pltpu.VMEM((tm, Dp_out), jnp.float32)],
            ),
            compiler_params=pltpu.CompilerParams(
                dimension_semantics=("parallel",),      # megacore sharding
                vmem_limit_bytes=_vmem_limit(n_wbuf),
            ),
            cost_estimate=cost,
        )(x2d, w1p, b1p, w2p, b2p)

    try:
        out = _run(True)
    except Exception:
        # TODO(synk): drop this fallback once pl.Buffered(1) single-buffering
        # is guaranteed on the installed jax; it only costs extra weight VMEM.
        out = _run(False)

    return out[:M, :D_out].reshape(B, N, D_out)


def mlp_pallas(x, w1, b1, w2, b2, *, tm=256, compute_dtype=jnp.bfloat16,
               hid_chunk=512, out_dtype=None):
    """Convenience wrapper (pads/casts params per call).  For repeated
    forwards, call prepare_mlp_params once and reuse mlp_pallas_prepared."""
    params, dims = prepare_mlp_params(
        w1, b1, w2, b2, compute_dtype=compute_dtype, hid_chunk=hid_chunk)
    return mlp_pallas_prepared(x, params, dims, tm=tm, out_dtype=out_dtype)


def mlp_reference(x, w1, b1, w2, b2):
    h = jnp.einsum("bnd,dh->bnh", x, w1) + b1
    h = jax.nn.gelu(h, approximate=False)
    return jnp.einsum("bnh,ho->bno", h, w2) + b2


if __name__ == "__main__":
    # Small shapes consistent with the module: batch=2, seq=8,
    # in_features=32, hidden_features=64, out_features=32.
    B, N = 2, 8
    D_in, D_hid, D_out = 32, 64, 32

    key = jax.random.PRNGKey(0)
    kx, kw1, kb1, kw2, kb2, kw1b, kb1b, kw2b = jax.random.split(key, 8)

    x = jax.random.normal(kx, (B, N, D_in), dtype=jnp.float32)
    w1 = jax.random.normal(kw1, (D_in, D_hid), dtype=jnp.float32) * 0.02
    b1 = jax.random.normal(kb1, (D_hid,), dtype=jnp.float32) * 0.01
    w2 = jax.random.normal(kw2, (D_hid, D_out), dtype=jnp.float32) * 0.02
    b2 = jax.random.normal(kb2, (D_out,), dtype=jnp.float32) * 0.01

    ref = mlp_reference(x, w1, b1, w2, b2)

    # Default path: bf16 MXU operands, f32 accumulation (multi-step grid).
    out_bf16 = jax.block_until_ready(mlp_pallas(x, w1, b1, w2, b2, tm=256))
    assert out_bf16.shape == (B, N, D_out)
    assert jnp.allclose(out_bf16, ref, atol=3e-2, rtol=3e-2), "bf16 mismatch"

    # Explicit f32-operand path (slower; accuracy-sensitive call sites only).
    out_f32 = jax.block_until_ready(
        mlp_pallas(x, w1, b1, w2, b2, tm=8, compute_dtype=jnp.float32))
    assert jnp.allclose(out_f32, ref, atol=2e-3, rtol=2e-3), "f32 mismatch"

    # Hidden-dim chunked path (n_chunks > 1) with params prepared once.
    D_hid2 = 256
    w1b = jax.random.normal(kw1b, (D_in, D_hid2), dtype=jnp.float32) * 0.02
    b1b = jax.random.normal(kb1b, (D_hid2,), dtype=jnp.float32) * 0.01
    w2b = jax.random.normal(kw2b, (D_hid2, D_out), dtype=jnp.float32) * 0.02
    ref2 = mlp_reference(x, w1b, b1b, w2b, b2)
    params2, dims2 = prepare_mlp_params(
        w1b, b1b, w2b, b2, compute_dtype=jnp.bfloat16, hid_chunk=128)
    assert dims2["n_chunks"] == 2
    out2 = jax.block_until_ready(mlp_pallas_prepared(x, params2, dims2, tm=8))
    assert out2.shape == (B, N, D_out)
    assert jnp.allclose(out2, ref2, atol=3e-2, rtol=3e-2), "chunked mismatch"

    print("KERNEL_OK")
</pallas_src>

<mosaic_0001>
module attributes {stable_mosaic.version = 11 : i64} {
  func.func @kernel(%arg0: i32, %arg1: memref<8x128xf32, #tpu.memory_space<vmem>>, %arg2: memref<1x128x128xbf16, #tpu.memory_space<vmem>>, %arg3: memref<1x1x128xf32, #tpu.memory_space<vmem>>, %arg4: memref<1x128x128xbf16, #tpu.memory_space<vmem>>, %arg5: memref<1x128xf32, #tpu.memory_space<vmem>>, %arg6: memref<8x128xf32, #tpu.memory_space<vmem>>, %arg7: memref<8x128xf32, #tpu.memory_space<vmem>>) attributes {dimension_semantics = [#tpu.dimension_semantics<parallel>], iteration_bounds = array<i64: 2>, scalar_prefetch = 0 : i64, scratch_operands = 1 : i64, tpu.core_type = #tpu.core_type<tc>, window_params = [{transform_indices = @transform_0, window_bounds = array<i64: 8, 128>}, {pipeline_mode = #tpu.pipeline_mode<synchronous>, transform_indices = @transform_1, window_bounds = array<i64: 1, 128, 128>}, {pipeline_mode = #tpu.pipeline_mode<synchronous>, transform_indices = @transform_2, window_bounds = array<i64: 1, 1, 128>}, {pipeline_mode = #tpu.pipeline_mode<synchronous>, transform_indices = @transform_3, window_bounds = array<i64: 1, 128, 128>}, {pipeline_mode = #tpu.pipeline_mode<synchronous>, transform_indices = @transform_4, window_bounds = array<i64: 1, 128>}, {transform_indices = @transform_5, window_bounds = array<i64: 8, 128>}]} {
    %c0 = arith.constant 0 : index
    %c0_0 = arith.constant 0 : index
    %0 = vector.load %arg1[%c0, %c0_0] : memref<8x128xf32, #tpu.memory_space<vmem>>, vector<8x128xf32>
    %1 = arith.truncf %0 : vector<8x128xf32> to vector<8x128xbf16>
    %cst = arith.constant 0.000000e+00 : f32
    %2 = vector.broadcast %cst : f32 to vector<8x128xf32>
    %c0_1 = arith.constant 0 : index
    %c0_2 = arith.constant 0 : index
    %3 = vector.load %arg7[%c0_1, %c0_2] : memref<8x128xf32, #tpu.memory_space<vmem>>, vector<8x128xf32>
    tpu.vector_store %arg7[%c0_1, %c0_2], %2 {strides = array<i32>} : memref<8x128xf32, #tpu.memory_space<vmem>>, vector<8x128xf32>,
    %c0_i32 = arith.constant 0 : i32
    %4 = arith.index_cast %c0_i32 : i32 to index
    %c0_3 = arith.constant 0 : index
    %c0_4 = arith.constant 0 : index
    %5 = vector.load %arg2[%4, %c0_3, %c0_4] : memref<1x128x128xbf16, #tpu.memory_space<vmem>>, vector<1x128x128xbf16>
    %6 = vector.shape_cast %5 : vector<1x128x128xbf16> to vector<128x128xbf16>
    %cst_5 = arith.constant dense<0.000000e+00> : vector<8x128xf32>
    %7 = tpu.matmul %1, %6, %cst_5 {dimension_numbers = #tpu.dot_dimension_numbers<[1], [0], [0], [1], [0, 0, 1, 1], [], []>} : vector<8x128xbf16>, vector<128x128xbf16>, vector<8x128xf32> -> vector<8x128xf32>
    %8 = arith.index_cast %c0_i32 : i32 to index
    %c0_6 = arith.constant 0 : index
    %c0_7 = arith.constant 0 : index
    %9 = vector.load %arg3[%8, %c0_6, %c0_7] : memref<1x1x128xf32, #tpu.memory_space<vmem>>, vector<1x1x128xf32>
    %10 = vector.shape_cast %9 : vector<1x1x128xf32> to vector<1x128xf32>
    %11 = vector.broadcast %10 : vector<1x128xf32> to vector<8x128xf32>
    %12 = arith.addf %7, %11 : vector<8x128xf32>
    %cst_8 = arith.constant 5.000000e-01 : f32
    %13 = vector.broadcast %cst_8 : f32 to vector<8x128xf32>
    %14 = arith.mulf %13, %12 : vector<8x128xf32>
    %cst_9 = arith.constant 0.707106769 : f32
    %15 = vector.broadcast %cst_9 : f32 to vector<8x128xf32>
    %16 = arith.mulf %12, %15 : vector<8x128xf32>
    %17 = math.erf %16 : vector<8x128xf32>
    %cst_10 = arith.constant 1.000000e+00 : f32
    %18 = vector.broadcast %cst_10 : f32 to vector<8x128xf32>
    %19 = arith.addf %18, %17 : vector<8x128xf32>
    %20 = arith.mulf %14, %19 : vector<8x128xf32>
    %c0_11 = arith.constant 0 : index
    %c0_12 = arith.constant 0 : index
    %21 = vector.load %arg7[%c0_11, %c0_12] : memref<8x128xf32, #tpu.memory_space<vmem>>, vector<8x128xf32>
    %22 = arith.truncf %20 : vector<8x128xf32> to vector<8x128xbf16>
    %23 = arith.index_cast %c0_i32 : i32 to index
    %c0_13 = arith.constant 0 : index
    %c0_14 = arith.constant 0 : index
    %24 = vector.load %arg4[%23, %c0_13, %c0_14] : memref<1x128x128xbf16, #tpu.memory_space<vmem>>, vector<1x128x128xbf16>
    %25 = vector.shape_cast %24 : vector<1x128x128xbf16> to vector<128x128xbf16>
    %cst_15 = arith.constant dense<0.000000e+00> : vector<8x128xf32>
    %26 = tpu.matmul %22, %25, %cst_15 {dimension_numbers = #tpu.dot_dimension_numbers<[1], [0], [0], [1], [0, 0, 1, 1], [], []>} : vector<8x128xbf16>, vector<128x128xbf16>, vector<8x128xf32> -> vector<8x128xf32>
    %27 = arith.addf %21, %26 : vector<8x128xf32>
    %c0_16 = arith.constant 0 : index
    %c0_17 = arith.constant 0 : index
    %28 = vector.load %arg7[%c0_16, %c0_17] : memref<8x128xf32, #tpu.memory_space<vmem>>, vector<8x128xf32>
    tpu.vector_store %arg7[%c0_16, %c0_17], %27 {strides = array<i32>} : memref<8x128xf32, #tpu.memory_space<vmem>>, vector<8x128xf32>,
    %c1_i32 = arith.constant 1 : i32
    %c0_18 = arith.constant 0 : index
    %c0_19 = arith.constant 0 : index
    %29 = vector.load %arg7[%c0_18, %c0_19] : memref<8x128xf32, #tpu.memory_space<vmem>>, vector<8x128xf32>
    %c0_20 = arith.constant 0 : index
    %c0_21 = arith.constant 0 : index
    %30 = vector.load %arg5[%c0_20, %c0_21] : memref<1x128xf32, #tpu.memory_space<vmem>>, vector<1x128xf32>
    %31 = vector.broadcast %30 : vector<1x128xf32> to vector<8x128xf32>
    %32 = arith.addf %29, %31 : vector<8x128xf32>
    %c0_22 = arith.constant 0 : index
    %c0_23 = arith.constant 0 : index
    %33 = vector.load %arg6[%c0_22, %c0_23] : memref<8x128xf32, #tpu.memory_space<vmem>>, vector<8x128xf32>
    tpu.vector_store %arg6[%c0_22, %c0_23], %32 {strides = array<i32>} : memref<8x128xf32, #tpu.memory_space<vmem>>, vector<8x128xf32>,
    return
  }
  func.func @transform_0(%arg0: i32) -> (i32, i32) {
    %c0_i32 = arith.constant 0 : i32
    %c0_i32_0 = arith.constant 0 : i32
    return %arg0, %c0_i32 : i32, i32
  }
  func.func @transform_1(%arg0: i32) -> (i32, i32, i32) {
    %c0_i32 = arith.constant 0 : i32
    %c0_i32_0 = arith.constant 0 : i32
    %c0_i32_1 = arith.constant 0 : i32
    %c0_i32_2 = arith.constant 0 : i32
    return %c0_i32, %c0_i32_0, %c0_i32_1 : i32, i32, i32
  }
  func.func @transform_2(%arg0: i32) -> (i32, i32, i32) {
    %c0_i32 = arith.constant 0 : i32
    %c0_i32_0 = arith.constant 0 : i32
    %c0_i32_1 = arith.constant 0 : i32
    %c0_i32_2 = arith.constant 0 : i32
    return %c0_i32, %c0_i32_0, %c0_i32_1 : i32, i32, i32
  }
  func.func @transform_3(%arg0: i32) -> (i32, i32, i32) {
    %c0_i32 = arith.constant 0 : i32
    %c0_i32_0 = arith.constant 0 : i32
    %c0_i32_1 = arith.constant 0 : i32
    %c0_i32_2 = arith.constant 0 : i32
    return %c0_i32, %c0_i32_0, %c0_i32_1 : i32, i32, i32
  }
  func.func @transform_4(%arg0: i32) -> (i32, i32) {
    %c0_i32 = arith.constant 0 : i32
    %c0_i32_0 = arith.constant 0 : i32
    %c0_i32_1 = arith.constant 0 : i32
    return %c0_i32, %c0_i32_0 : i32, i32
  }
  func.func @transform_5(%arg0: i32) -> (i32, i32) {
    %c0_i32 = arith.constant 0 : i32
    %c0_i32_0 = arith.constant 0 : i32
    return %arg0, %c0_i32 : i32, i32
  }
}

module attributes {stable_mosaic.version = 11 : i64} {
  func.func @kernel(%arg0: i32, %arg1: memref<8x128xf32, #tpu.memory_space<vmem>>, %arg2: memref<1x128x128xbf16, #tpu.memory_space<vmem>>, %arg3: memref<1x1x128xf32, #tpu.memory_space<vmem>>, %arg4: memref<1x128x128xbf16, #tpu.memory_space<vmem>>, %arg5: memref<1x128xf32, #tpu.memory_space<vmem>>, %arg6: memref<8x128xf32, #tpu.memory_space<vmem>>, %arg7: memref<8x128xf32, #tpu.memory_space<vmem>>) attributes {dimension_semantics = [#tpu.dimension_semantics<parallel>], iteration_bounds = array<i64: 2>, scalar_prefetch = 0 : i64, scratch_operands = 1 : i64, tpu.core_type = #tpu.core_type<tc>, window_params = [{transform_indices = @transform_0, window_bounds = array<i64: 8, 128>}, {pipeline_mode = #tpu.pipeline_mode<synchronous>, transform_indices = @transform_1, window_bounds = array<i64: 1, 128, 128>}, {pipeline_mode = #tpu.pipeline_mode<synchronous>, transform_indices = @transform_2, window_bounds = array<i64: 1, 1, 128>}, {pipeline_mode = #tpu.pipeline_mode<synchronous>, transform_indices = @transform_3, window_bounds = array<i64: 1, 128, 128>}, {pipeline_mode = #tpu.pipeline_mode<synchronous>, transform_indices = @transform_4, window_bounds = array<i64: 1, 128>}, {transform_indices = @transform_5, window_bounds = array<i64: 8, 128>}]} {
    %c0 = arith.constant 0 : index
    %c0_0 = arith.constant 0 : index
    %0 = vector.load %arg1[%c0, %c0_0] : memref<8x128xf32, #tpu.memory_space<vmem>>, vector<8x128xf32>
    %1 = arith.truncf %0 : vector<8x128xf32> to vector<8x128xbf16>
    %cst = arith.constant 0.000000e+00 : f32
    %2 = vector.broadcast %cst : f32 to vector<8x128xf32>
    %c0_1 = arith.constant 0 : index
    %c0_2 = arith.constant 0 : index
    %3 = vector.load %arg7[%c0_1, %c0_2] : memref<8x128xf32, #tpu.memory_space<vmem>>, vector<8x128xf32>
    tpu.vector_store %arg7[%c0_1, %c0_2], %2 {strides = array<i32>} : memref<8x128xf32, #tpu.memory_space<vmem>>, vector<8x128xf32>,
    %c0_i32 = arith.constant 0 : i32
    %4 = arith.index_cast %c0_i32 : i32 to index
    %c0_3 = arith.constant 0 : index
    %c0_4 = arith.constant 0 : index
    %5 = vector.load %arg2[%4, %c0_3, %c0_4] : memref<1x128x128xbf16, #tpu.memory_space<vmem>>, vector<1x128x128xbf16>
    %6 = vector.shape_cast %5 : vector<1x128x128xbf16> to vector<128x128xbf16>
    %cst_5 = arith.constant dense<0.000000e+00> : vector<8x128xf32>
    %7 = tpu.matmul %1, %6, %cst_5 {dimension_numbers = #tpu.dot_dimension_numbers<[1], [0], [0], [1], [0, 0, 1, 1], [], []>} : vector<8x128xbf16>, vector<128x128xbf16>, vector<8x128xf32> -> vector<8x128xf32>
    %8 = arith.index_cast %c0_i32 : i32 to index
    %c0_6 = arith.constant 0 : index
    %c0_7 = arith.constant 0 : index
    %9 = vector.load %arg3[%8, %c0_6, %c0_7] : memref<1x1x128xf32, #tpu.memory_space<vmem>>, vector<1x1x128xf32>
    %10 = vector.shape_cast %9 : vector<1x1x128xf32> to vector<1x128xf32>
    %11 = vector.broadcast %10 : vector<1x128xf32> to vector<8x128xf32>
    %12 = arith.addf %7, %11 : vector<8x128xf32>
    %cst_8 = arith.constant 5.000000e-01 : f32
    %13 = vector.broadcast %cst_8 : f32 to vector<8x128xf32>
    %14 = arith.mulf %13, %12 : vector<8x128xf32>
    %cst_9 = arith.constant 0.707106769 : f32
    %15 = vector.broadcast %cst_9 : f32 to vector<8x128xf32>
    %16 = arith.mulf %12, %15 : vector<8x128xf32>
    %17 = math.erf %16 : vector<8x128xf32>
    %cst_10 = arith.constant 1.000000e+00 : f32
    %18 = vector.broadcast %cst_10 : f32 to vector<8x128xf32>
    %19 = arith.addf %18, %17 : vector<8x128xf32>
    %20 = arith.mulf %14, %19 : vector<8x128xf32>
    %c0_11 = arith.constant 0 : index
    %c0_12 = arith.constant 0 : index
    %21 = vector.load %arg7[%c0_11, %c0_12] : memref<8x128xf32, #tpu.memory_space<vmem>>, vector<8x128xf32>
    %22 = arith.truncf %20 : vector<8x128xf32> to vector<8x128xbf16>
    %23 = arith.index_cast %c0_i32 : i32 to index
    %c0_13 = arith.constant 0 : index
    %c0_14 = arith.constant 0 : index
    %24 = vector.load %arg4[%23, %c0_13, %c0_14] : memref<1x128x128xbf16, #tpu.memory_space<vmem>>, vector<1x128x128xbf16>
    %25 = vector.shape_cast %24 : vector<1x128x128xbf16> to vector<128x128xbf16>
    %cst_15 = arith.constant dense<0.000000e+00> : vector<8x128xf32>
    %26 = tpu.matmul %22, %25, %cst_15 {dimension_numbers = #tpu.dot_dimension_numbers<[1], [0], [0], [1], [0, 0, 1, 1], [], []>} : vector<8x128xbf16>, vector<128x128xbf16>, vector<8x128xf32> -> vector<8x128xf32>
    %27 = arith.addf %21, %26 : vector<8x128xf32>
    %c0_16 = arith.constant 0 : index
    %c0_17 = arith.constant 0 : index
    %28 = vector.load %arg7[%c0_16, %c0_17] : memref<8x128xf32, #tpu.memory_space<vmem>>, vector<8x128xf32>
    tpu.vector_store %arg7[%c0_16, %c0_17], %27 {strides = array<i32>} : memref<8x128xf32, #tpu.memory_space<vmem>>, vector<8x128xf32>,
    %c1_i32 = arith.constant 1 : i32
    %c0_18 = arith.constant 0 : index
    %c0_19 = arith.constant 0 : index
    %29 = vector.load %arg7[%c0_18, %c0_19] : memref<8x128xf32, #tpu.memory_space<vmem>>, vector<8x128xf32>
    %c0_20 = arith.constant 0 : index
    %c0_21 = arith.constant 0 : index
    %30 = vector.load %arg5[%c0_20, %c0_21] : memref<1x128xf32, #tpu.memory_space<vmem>>, vector<1x128xf32>
    %31 = vector.broadcast %30 : vector<1x128xf32> to vector<8x128xf32>
    %32 = arith.addf %29, %31 : vector<8x128xf32>
    %c0_22 = arith.constant 0 : index
    %c0_23 = arith.constant 0 : index
    %33 = vector.load %arg6[%c0_22, %c0_23] : memref<8x128xf32, #tpu.memory_space<vmem>>, vector<8x128xf32>
    tpu.vector_store %arg6[%c0_22, %c0_23], %32 {strides = array<i32>} : memref<8x128xf32, #tpu.memory_space<vmem>>, vector<8x128xf32>,
    return
  }
  func.func @transform_0(%arg0: i32) -> (i32, i32) {
    %c0_i32 = arith.constant 0 : i32
    %c0_i32_0 = arith.constant 0 : i32
    return %arg0, %c0_i32 : i32, i32
  }
  func.func @transform_1(%arg0: i32) -> (i32, i32, i32) {
    %c0_i32 = arith.constant 0 : i32
    %c0_i32_0 = arith.constant 0 : i32
    %c0_i32_1 = arith.constant 0 : i32
    %c0_i32_2 = arith.constant 0 : i32
    return %c0_i32, %c0_i32_0, %c0_i32_1 : i32, i32, i32
  }
  func.func @transform_2(%arg0: i32) -> (i32, i32, i32) {
    %c0_i32 = arith.constant 0 : i32
    %c0_i32_0 = arith.constant 0 : i32
    %c0_i32_1 = arith.constant 0 : i32
    %c0_i32_2 = arith.constant 0 : i32
    return %c0_i32, %c0_i32_0, %c0_i32_1 : i32, i32, i32
  }
  func.func @transform_3(%arg0: i32) -> (i32, i32, i32) {
    %c0_i32 = arith.constant 0 : i32
    %c0_i32_0 = arith.constant 0 : i32
    %c0_i32_1 = arith.constant 0 : i32
    %c0_i32_2 = arith.constant 0 : i32
    return %c0_i32, %c0_i32_0, %c0_i32_1 : i32, i32, i32
  }
  func.func @transform_4(%arg0: i32) -> (i32, i32) {
    %c0_i32 = arith.constant 0 : i32
    %c0_i32_0 = arith.constant 0 : i32
    %c0_i32_1 = arith.constant 0 : i32
    return %c0_i32, %c0_i32_0 : i32, i32
  }
  func.func @transform_5(%arg0: i32) -> (i32, i32) {
    %c0_i32 = arith.constant 0 : i32
    %c0_i32_0 = arith.constant 0 : i32
    return %arg0, %c0_i32 : i32, i32
  }
}

</mosaic_0001>

<bundles_post_ra>
// kernel: tpu_custom_call.1
= control target key start
LH: loop header
LB: loop body
LE: loop exit
PB: predicated region body
PF: predicated region fallthrough
CT: control target
= control target key end

     0   :  { %10 = vsyncpa [#allocation4], 0  ;;  %s1229_s0 = inlined_call_operand.hbm [shape: f32[16,128], index: 0, kind: input, shape index: {}]   ;;  %s1230_s1 = inlined_call_operand.hbm [shape: bf16[1,128,128], index: 1, kind: input, shape index: {}]   ;;  %s1231_s2 = inlined_call_operand.vmem [shape: f32[1,1,128], index: 2, kind: input, shape index: {}]   ;;  %s1232_s3 = inlined_call_operand.hbm [shape: bf16[1,128,128], index: 3, kind: input, shape index: {}]   ;;  %s1233_s4 = inlined_call_operand.vmem [shape: f32[1,128], index: 4, kind: input, shape index: {}]   ;;  %s1234_s5 = inlined_call_operand.hbm [shape: f32[16,128], index: 5, kind: output, shape index: {}]  }
   0x1   :  { %12 = vsyncpa [#allocation4 + $0x1], 0 }
   0x2   :  { %13 = vsyncpa [#allocation7], 0 }
   0x3   :  { %14 = vsyncpa [#allocation5], 0 }
   0x4   :  { %16 = vsyncpa [#allocation5 + $0x1], 0  ;;  %s987_s18 = smov 0   ;;  %s989_s19 = smov 0  }
   0x5   :  { %s991_s20 = smov 0   ;;  %s993_s21 = smov 0  }
   0x6 LB: > { %s1008_s22 = sadd.s32 4294967295, %s947_s21   ;;  %s610_s23 = sadd.s32 4294967294, %s947_s21   ;;  %s947_s21 = sphi %s993_s21, %s1254_s21   ;;  %s943_s20 = sphi %s991_s20, %s1253_s20   ;;  %s939_s19 = sphi %s989_s19, %s1252_s19   ;;  %s935_s18 = sphi %s987_s18, %s1251_s18  }
   0x7   : > { %p42_p0 = scmp.ne.s32.totalorder %s939_s19, %s935_s18  ;;  %p1235_p1 = scmp.eq.s32.totalorder %s1008_s22, 0 }
   0x8   : > { %p156_p3 = scmp.eq.s32.totalorder %s610_s23, 1  ;;  %p611_p5 = scmp.ge.s32.totalorder %s947_s21, 1 }
   0x9   : > { %p1017_p4 = por %p1235_p1, %p42_p0  ;;  %p163_p7 = scmp.lt.s32.totalorder %s947_s21, 3 }
   0xa   : > { %p1022_p6 = por %p156_p3, %p42_p0  ;;  %s949_s27 = smov [#allocation6]  }
   0xb   : > { %s1238_s24 = scalar_select %p1017_p4, 1, 0 }
   0xc   : > { %s1239_s25 = scalar_select %p1022_p6, 1, 0 }
   0xd   : > { %p1027_p8 = pnand %p611_p5, %p163_p7  ;;  %s175_s28 = sshll.u32 %s949_s27, 4  ;;  %s1031_s28 = int_to_ptr.vmem [resolvable:$true] %s175_s28 }
   0xe   : > { %s950_s30 = smov [#allocation8]   ;;  %s791_s9 = scalar_lea.hbm %s1230_s1, 1024 }
   0xf   : > { %p714_p9 = pneg %p1027_p8  ;;  %s191_s6 = sshll.u32 %s950_s30, 4  ;;  %s1042_s6 = int_to_ptr.vmem [resolvable:$true] %s191_s6 }
  0x10   : > { %p792_p12 = scmp.ne.s32.totalorder %s1230_s1, %s791_s9  ;;  %p798_p5 = scmp.lt.u32.totalorder %s791_s9, %s1230_s1 }
  0x11   : > { %p1038_p11 = pnand %p714_p9, %p1235_p1 }
  0x13   : > { %p793_p13 = pneg %p1038_p11 }
  0x15   : > { %p794_p0 = pnand %p793_p13, %p792_p12 }
  0x17   : > { %p795_p3 = pneg %p794_p0 }
  0x19   : > { %p800_p7 = pnand %p798_p5, %p795_p3 }
  0x1b   : > { %803 = shalt.err (!%p800_p7)
}
  0x1c   : > { %s804_s14 = scalar_lea.vmem %s1031_s28, 1024  ;;  %p812_p2 = scmp.lt.s32.totalorder %s1031_s28, %s1031_s28 }
  0x1d   : > { %p805_p9 = scmp.ne.s32.totalorder %s1031_s28, %s804_s14  ;;  %p813_p12 = scmp.lt.s32.totalorder %s804_s14, %s804_s14 }
  0x1f   : > { %p807_p10 = pnand %p805_p9, %p793_p13  ;;  %p814_p0 = por %p813_p12, %p812_p2 }
  0x21   : > { %p808_p1 = pneg %p807_p10 }
  0x23   : > { %p815_p6 = pnand %p814_p0, %p808_p1 }
  0x25   : > { %818 = shalt.err (!%p815_p6)
}
  0x26   : > { %s951_s15 = smov 64   ;;  %s952_s16 = smov 4  }
  0x27   : > { %717 = dma.hbm_to_vmem [thread:$0]  (!%p1038_p11), %s1230_s1, 1024, %s1031_s28, [#allocation7], %s951_s15, %s951_s15, %s952_s16  }
  0x28   : > { %s819_s7 = scalar_lea.hbm %s1232_s3, 1024 }
  0x29   : > { %p820_p2 = scmp.ne.s32.totalorder %s1232_s3, %s819_s7  ;;  %p826_p10 = scmp.lt.u32.totalorder %s819_s7, %s1232_s3 }
  0x2b   : > { %p822_p1 = pnand %p820_p2, %p793_p13 }
  0x2d   : > { %p823_p6 = pneg %p822_p1 }
  0x2f   : > { %p828_p3 = pnand %p826_p10, %p823_p6 }
  0x31   : > { %831 = shalt.err (!%p828_p3)
}
  0x32   : > { %s832_s28 = scalar_lea.vmem %s1042_s6, 1024  ;;  %p840_p12 = scmp.lt.s32.totalorder %s1042_s6, %s1042_s6 }
  0x33   : > { %p833_p5 = scmp.ne.s32.totalorder %s1042_s6, %s832_s28  ;;  %p841_p0 = scmp.lt.s32.totalorder %s832_s28, %s832_s28 }
  0x35   : > { %p835_p7 = pnand %p833_p5, %p793_p13  ;;  %p842_p2 = por %p841_p0, %p840_p12 }
  0x37   : > { %p836_p9 = pneg %p835_p7 }
  0x39   : > { %p843_p1 = pnand %p842_p2, %p836_p9 }
  0x3b   : > { %846 = shalt.err (!%p843_p1)
}
  0x3c   : > { %720 = dma.hbm_to_vmem [thread:$0]  (!%p1038_p11), %s1232_s3, 1024, %s1042_s6, [#allocation7], %s951_s15, %s951_s15, %s952_s16  }
  0x3d   : > { %s1097_s14 = sadd.s32 1, %s947_s21   ;;  %s29_s29 = sadd.s32 1, %s943_s20 }
  0x3e   : > { %s26_s17 = ssub.s32 %s947_s21, %s1097_s14  ;;  %p36_p13 = scmp.ne.s32.totalorder %s943_s20, %s939_s19 }
  0x3f   : > { %p27_p6 = scmp.eq.s32.totalorder %s26_s17, 0  ;;  %p37_p10 = scmp.eq.s32.totalorder %s947_s21, 0 }
  0x40   : > { %p1242_p3 = scmp.eq.s32.totalorder %s1008_s22, 1  ;;  %p731_p7 = scmp.lt.s32.totalorder %s947_s21, 2 }
  0x41   : > { %s1113_s27 = scalar_select %p27_p6, %s943_s20, %s29_s29  }
  0x42   : > { %p1107_p5 = por %p1242_p3, %p36_p13  ;;  %p38_p9 = por %p37_p10, %p36_p13 }
  0x43   : > { %s208_s30 = sand.u32 1, %s943_s20   ;;  %s616_s6 = sshll.u32 %s947_s21, 7 }
  0x44   : > { %s1243_s23 = scalar_select %p1107_p5, 1, 0 }
  0x45   : > { %s615_s7 = sshll.u32 %s208_s30, 3  ;;  %s1120_s8 = scalar_lea.hbm %s1229_s0, %s616_s6 }
  0x46   : > { %s212_s9 = scalar_lea.vmem [#allocation3], %s615_s7  ;;  %p1124_p11 = pnand %p731_p7, %p38_p9 }
  0x47   : > { %s219_s10 = sshll.u32 %s212_s9, 4  ;;  %s209_s28 = scalar_lea.sflag [#allocation4], %s208_s30  ;;  %s1122_s10 = int_to_ptr.vmem [resolvable:$true] %s219_s10 }
  0x48   : > { %s847_s12 = scalar_lea.hbm %s1120_s8, 128  ;;  %p849_p0 = pneg %p1124_p11 }
  0x49   : > { %p848_p12 = scmp.ne.s32.totalorder %s1120_s8, %s847_s12  ;;  %s852_s17 = scalar_lea.hbm %s1229_s0, 256 }
  0x4a   : > { %p853_p13 = scmp.lt.u32.totalorder %s1120_s8, %s1229_s0  ;;  %p854_p6 = scmp.lt.u32.totalorder %s852_s17, %s847_s12 }
  0x4b   : > { %p850_p2 = pnand %p849_p0, %p848_p12  ;;  %p856_p3 = scmp.lt.u32.totalorder %s847_s12, %s1120_s8 }
  0x4c   : > { %p855_p10 = por %p854_p6, %p853_p13 }
  0x4d   : > { %p851_p1 = pneg %p850_p2 }
  0x4e   : > { %p857_p7 = por %p856_p3, %p855_p10 }
  0x50   : > { %p858_p9 = pnand %p857_p7, %p851_p1 }
  0x52   : > { %861 = shalt.err (!%p858_p9)
}
  0x53   : > { %s862_s30 = scalar_lea.vmem %s1122_s10, 128  ;;  %s953_s15 = smov [#allocation3]  }
  0x54   : > { %p863_p12 = scmp.ne.s32.totalorder %s1122_s10, %s862_s30  ;;  %s867_s16 = sshll.u32 %s953_s15, 4  ;;  %s868_s16 = int_to_ptr.vmem [resolvable:$false] %s867_s16 }
  0x55   : > { %s869_s9 = scalar_lea.vmem %s868_s16, 256  ;;  %p870_p4 = scmp.lt.s32.totalorder %s1122_s10, %s868_s16 }
  0x56   : > { %p865_p2 = pnand %p863_p12, %p849_p0  ;;  %p871_p13 = scmp.lt.s32.totalorder %s869_s9, %s862_s30 }
  0x58   : > { %p866_p5 = pneg %p865_p2  ;;  %p872_p6 = por %p871_p13, %p870_p4 }
  0x5a   : > { %p873_p10 = pnand %p872_p6, %p866_p5 }
  0x5c   : > { %876 = shalt.err (!%p873_p10)
}
  0x5d   : > { %724 = dma.hbm_to_vmem [thread:$0]  (!%p1124_p11), %s1120_s8, 128, %s1122_s10, %s209_s28  }
  0x5e   : > { %228 = sbr.rel (%p1027_p8) target bundleno = 600 (0x258), region = 40  ;;  %s1156_s12 = sand.u32 (!%p1027_p8), 1, %s939_s19  }
  0x5f   : > { %s618_s13 = sshll.u32 (!%p1027_p8), %s1156_s12, 3  ;;  %s231_s29 = scalar_lea.sflag (!%p1027_p8), [#allocation4], %s1156_s12 }
  0x60   : > { %s1162_s17 = scalar_lea.vmem (!%p1027_p8), [#allocation3], %s618_s13  ;;  %p1245_p4 = scmp.ne.s32.totalorder (!%p1027_p8), %s1238_s24, 0 }
  0x65   : > { %922 = dma.done.wait (%p1245_p4), %s231_s29, 128  }
  0x66   : > { %924 = vsyncadd (%p1245_p4), %s231_s29, 4294967168  ;;  %p1246_p5 = scmp.eq.s32.totalorder %s1008_s22, 0 }
  0x68   : > { %926 = dma.done.wait (%p1246_p5), [#allocation7], 2048   ;;  %p1247_p8 = pmov %p1246_p5 }
  0x69   : > { %v954_v0 = vmov 0.0   ;;  %vm955_vm0 = vmmov 0   ;;  %v773_v1 = vld [vmem:[#allocation6] sm:$0xff]   ;;  %v774_v2 = vld [vmem:[#allocation6 + $0x8] sm:$0xff]   ;;  %v775_v3 = vld [vmem:[#allocation6 + $0x10] sm:$0xff]   ;;  %s641_s11 = sshll.u32 %s1008_s22, 7 }
  0x6a   : > { %928 = vsyncadd (%p1247_p8), [#allocation7], 4294965248  ;;  %662 = vmatprep.subr.bf16.mxu0 %v954_v0  ;;  %678 = vmatprep.mubr.msk.bf16.mxu0 %vm955_vm0, %v954_v0  ;;  %v781_v4 = vld [vmem:[#allocation8] sm:$0xff]   ;;  %v776_v5 = vld [vmem:[#allocation6 + $0x18] sm:$0xff]   ;;  %s268_s28 = scalar_lea.vmem [#allocation9], %s618_s13  ;;  %s1185_s15 = scalar_lea.hbm %s1234_s5, %s641_s11 }
  0x6b   : > { %682 = vmatprep.subr.bf16.mxu1 %v954_v0  ;;  %698 = vmatprep.mubr.msk.bf16.mxu1 %vm955_vm0, %v954_v0  ;;  %v782_v6 = vld [vmem:[#allocation8 + $0x8] sm:$0xff]   ;;  %v777_v7 = vld [vmem:[#allocation6 + $0x20] sm:$0xff]   ;;  %v783_v8 = vld [vmem:[#allocation8 + $0x10] sm:$0xff]   ;;  %s521_s7 = sshll.u32 %s268_s28, 4  ;;  %s508_s22 = scalar_lea.sflag [#allocation5], %s1156_s12  ;;  %s1187_s7 = int_to_ptr.vmem [resolvable:$true] %s521_s7 }
  0x6c   : > { %663 = vmatpush3.bf16.msra.mxu0 %v773_v1  ;;  %683 = vmatpush3.bf16.msra.mxu1 %v781_v4  ;;  %v778_v9 = vld [vmem:[#allocation6 + $0x28] sm:$0xff]   ;;  %v779_v10 = vld [vmem:[#allocation6 + $0x30] sm:$0xff]   ;;  %v780_v11 = vld [vmem:[#allocation6 + $0x38] sm:$0xff]   ;;  %s877_s16 = scalar_lea.vmem %s1187_s7, 128  ;;  %p1248_p0 = scmp.ne.s32.totalorder %s1243_s23, 0 }
  0x6d   : > { %664 = vmatprep.subr.bf16.mxu0 %v954_v0  ;;  %684 = vmatprep.subr.bf16.mxu1 %v954_v0  ;;  %v270_v12 = vld [vmem:[%s1162_s17] sm:$0xff]  ;;  %v785_v15 = vld [vmem:[#allocation8 + $0x20] sm:$0xff]   ;;  %v786_v16 = vld [vmem:[#allocation8 + $0x28] sm:$0xff]   ;;  %p878_p11 = scmp.ne.s32.totalorder %s1187_s7, %s877_s16  ;;  %s956_s9 = smov [#allocation9]  }
  0x6e   : > { %v271_v13 = vpack.c.bf16 %v270_v12, %v270_v12  ;;  %v784_v14 = vld [vmem:[#allocation8 + $0x18] sm:$0xff]   ;;  %v787_v17 = vld [vmem:[#allocation8 + $0x30] sm:$0xff]   ;;  %s881_s13 = sshll.u32 %s956_s9, 4  ;;  %s882_s13 = int_to_ptr.vmem [resolvable:$false] %s881_s13 }
  0x6f   : > { %v788_v18 = vld [vmem:[#allocation8 + $0x38] sm:$0xff]   ;;  %v622_v19 = vld [vmem:[%s1231_s2] ss:$0 sm:$0xff]  ;;  %p879_p1 = pnand %p878_p11, %p1248_p0  ;;  %s883_s29 = scalar_lea.vmem %s882_s13, 256 }
  0x70   : > { %665 = vmatpush3.bf16.msra.mxu0 %v774_v2  ;;  %685 = vmatpush3.bf16.msra.mxu1 %v782_v6  ;;  %v639_v31 = vld [vmem:[%s1233_s4] ss:$0 sm:$0xff]  ;;  %p884_p7 = scmp.lt.s32.totalorder %s1187_s7, %s882_s13  ;;  %p885_p9 = scmp.lt.s32.totalorder %s883_s29, %s877_s16 }
  0x71   : > { %666 = vmatprep.subr.bf16.mxu0 %v954_v0  ;;  %686 = vmatprep.subr.bf16.mxu1 %v954_v0  ;;  %p880_p3 = pneg %p879_p1 }
  0x72   : > { %p886_p12 = por %p885_p9, %p884_p7 }
  0x74   : > { %667 = vmatpush3.bf16.msra.mxu0 %v775_v3  ;;  %687 = vmatpush3.bf16.msra.mxu1 %v783_v8  ;;  %p887_p2 = pnand %p886_p12, %p880_p3 }
  0x75   : > { %668 = vmatprep.subr.bf16.mxu0 %v954_v0  ;;  %688 = vmatprep.subr.bf16.mxu1 %v954_v0 }
  0x78   : > { %669 = vmatpush3.bf16.msra.mxu0 %v776_v5  ;;  %689 = vmatpush3.bf16.msra.mxu1 %v784_v14 }
  0x79   : > { %670 = vmatprep.subr.bf16.mxu0 %v954_v0  ;;  %690 = vmatprep.subr.bf16.mxu1 %v954_v0 }
  0x7c   : > { %671 = vmatpush3.bf16.msra.mxu0 %v777_v7  ;;  %691 = vmatpush3.bf16.msra.mxu1 %v785_v15 }
  0x7d   : > { %672 = vmatprep.subr.bf16.mxu0 %v954_v0  ;;  %692 = vmatprep.subr.bf16.mxu1 %v954_v0 }
  0x80   : > { %673 = vmatpush3.bf16.msra.mxu0 %v778_v9  ;;  %693 = vmatpush3.bf16.msra.mxu1 %v786_v16 }
  0x81   : > { %674 = vmatprep.subr.bf16.mxu0 %v954_v0  ;;  %694 = vmatprep.subr.bf16.mxu1 %v954_v0 }
  0x84   : > { %675 = vmatpush3.bf16.msra.mxu0 %v779_v10  ;;  %695 = vmatpush3.bf16.msra.mxu1 %v787_v17 }
  0x85   : > { %676 = vmatprep.subr.bf16.mxu0 %v954_v0  ;;  %696 = vmatprep.subr.bf16.mxu1 %v954_v0 }
  0x88   : > { %677 = vmatpush3.bf16.msra.mxu0 %v780_v11  ;;  %697 = vmatpush3.bf16.msra.mxu1 %v788_v18 }
  0x8b   : > { %679 = vmatmul.mubr.bf16.vlgmr.msra.gmra.mrb[0].mxu0 %v271_v13 }
 0x15e   : > { %v378_v20 = vpop.f32.mrb[0].mxu0 }
 0x15f   : > { %v379_v21 = vadd.f32 %v622_v19, %v378_v20  ;;  %v680_v22 = vpop.f32.mrb[1].mxu0 }
 0x160   : > { %v381_v23 = vpop.f32.mrb[2].mxu0 }
 0x161   : > { %v385_v24 = vmul.f32 0.70710677, %v379_v21  ;;  %v681_v25 = vpop.f32.mrb[3].mxu0  ;;  %v384_v27 = vmul.f32 0.5, %v379_v21 }
 0x163   : > { %789 = verf.f32 %v385_v24 }
 0x16d   : > { %v790_v26 = vpop.eup %789 }
 0x16e   : > { %v387_v28 = vadd.f32 1.0, %v790_v26 }
 0x170   : > { %v388_v29 = vmul.f32 %v387_v28, %v384_v27 }
 0x172   : > { %v390_v30 = vpack.c.bf16 %v388_v29, %v388_v29 }
 0x174   : > { %699 = vmatmul.mubr.bf16.vlgmr.msra.gmra.mrb[0].mxu1 %v390_v30 }
 0x247   : > { %v489_v32 = vpop.f32.mrb[0].mxu1 }
 0x248   : > { %v505_v33 = vadd.f32 %v639_v31, %v489_v32  ;;  %v700_v34 = vpop.f32.mrb[1].mxu1 }
 0x249   : > { %v492_v35 = vpop.f32.mrb[2].mxu1 }
 0x24a   : > { %506 = vst [vmem:[%s268_s28] sm:$0xff] %v505_v33  ;;  %v701_v36 = vpop.f32.mrb[3].mxu1 }
 0x24b   : > { %890 = shalt.err (!%p887_p2)
}
 0x24c   : > { %s891_s12 = scalar_lea.hbm %s1185_s15, 128  ;;  %s895_s26 = scalar_lea.hbm %s1234_s5, 256 }
 0x24d   : > { %p892_p13 = scmp.ne.s32.totalorder %s1185_s15, %s891_s12  ;;  %p896_p4 = scmp.lt.u32.totalorder %s1185_s15, %s1234_s5 }
 0x24e   : > { %p897_p5 = scmp.lt.u32.totalorder %s895_s26, %s891_s12  ;;  %p899_p11 = scmp.lt.u32.totalorder %s891_s12, %s1185_s15 }
 0x24f   : > { %p893_p6 = pnand %p892_p13, %p1248_p0 }
 0x250   : > { %p898_p8 = por %p897_p5, %p896_p4 }
 0x251   : > { %p894_p10 = pneg %p893_p6 }
 0x252   : > { %p900_p1 = por %p899_p11, %p898_p8 }
 0x254   : > { %p901_p3 = pnand %p900_p1, %p894_p10 }
 0x256   : > { %904 = shalt.err (!%p901_p3)
}
 0x257   : > { %712 = dma.vmem_to_hbm [thread:$0]  (%p1248_p0), %s1187_s7, 128, %s1185_s15, %s508_s22  }
 0x258 PF: > { %s533_s11 = sand.u32 1, %s935_s18   ;;  %p1249_p7 = scmp.ne.s32.totalorder %s1239_s25, 0 }
 0x259   : > { %p1250_p9 = scmp.ge.s32.totalorder %s947_s21, 2  ;;  %s534_s28 = scalar_lea.sflag [#allocation5], %s533_s11 }
 0x25b   : > { %p726_p12 = pnand %p1250_p9, %p1249_p7 }
 0x25d   : > { %930 = dma.done.wait (!%p726_p12), %s534_s28, 128  }
 0x25e   : > { %932 = vsyncadd (!%p726_p12), %s534_s28, 4294967168  ;;  %p19_p2 = scmp.ge.s32.totalorder %s1097_s14, 4   ;;  %s1251_s18 = smov %s939_s19 }
 0x25f   : > { %s1252_s19 = smov %s943_s20  ;;  %s1253_s20 = smov %s1113_s27 }
 0x260   : > { %s1254_s21 = smov %s1097_s14  ;;  %21 = sbr.rel (!%p19_p2) target bundleno = 6 (0x6), region = 93 }
 0x267   :  { %539 = vsyncpa [#allocation4], 1 }
 0x268   :  { %541 = vsyncpa [#allocation4 + $0x1], 1 }
 0x269   :  { %542 = vsyncpa [#allocation7], 1 }
 0x26a   :  { %543 = vsyncpa [#allocation5], 1 }
 0x26b   :  { %545 = vsyncpa [#allocation5 + $0x1], 1 }

// kernel: tpu_custom_call.1
= control target key start
LH: loop header
LB: loop body
LE: loop exit
PB: predicated region body
PF: predicated region fallthrough
CT: control target
= control target key end

     0   :  { %10 = vsyncpa [#allocation4], 0  ;;  %s1229_s0 = inlined_call_operand.hbm [shape: f32[16,128], index: 0, kind: input, shape index: {}]   ;;  %s1230_s1 = inlined_call_operand.hbm [shape: bf16[1,128,128], index: 1, kind: input, shape index: {}]   ;;  %s1231_s2 = inlined_call_operand.vmem [shape: f32[1,1,128], index: 2, kind: input, shape index: {}]   ;;  %s1232_s3 = inlined_call_operand.hbm [shape: bf16[1,128,128], index: 3, kind: input, shape index: {}]   ;;  %s1233_s4 = inlined_call_operand.vmem [shape: f32[1,128], index: 4, kind: input, shape index: {}]   ;;  %s1234_s5 = inlined_call_operand.hbm [shape: f32[16,128], index: 5, kind: output, shape index: {}]  }
   0x1   :  { %12 = vsyncpa [#allocation4 + $0x1], 0 }
   0x2   :  { %13 = vsyncpa [#allocation7], 0 }
   0x3   :  { %14 = vsyncpa [#allocation5], 0 }
   0x4   :  { %16 = vsyncpa [#allocation5 + $0x1], 0  ;;  %s987_s18 = smov 0   ;;  %s989_s19 = smov 0  }
   0x5   :  { %s991_s20 = smov 0   ;;  %s993_s21 = smov 0  }
   0x6 LB: > { %s1008_s22 = sadd.s32 4294967295, %s947_s21   ;;  %s610_s23 = sadd.s32 4294967294, %s947_s21   ;;  %s947_s21 = sphi %s993_s21, %s1254_s21   ;;  %s943_s20 = sphi %s991_s20, %s1253_s20   ;;  %s939_s19 = sphi %s989_s19, %s1252_s19   ;;  %s935_s18 = sphi %s987_s18, %s1251_s18  }
   0x7   : > { %p42_p0 = scmp.ne.s32.totalorder %s939_s19, %s935_s18  ;;  %p1235_p1 = scmp.eq.s32.totalorder %s1008_s22, 0 }
   0x8   : > { %p156_p3 = scmp.eq.s32.totalorder %s610_s23, 1  ;;  %p611_p5 = scmp.ge.s32.totalorder %s947_s21, 1 }
   0x9   : > { %p1017_p4 = por %p1235_p1, %p42_p0  ;;  %p163_p7 = scmp.lt.s32.totalorder %s947_s21, 3 }
   0xa   : > { %p1022_p6 = por %p156_p3, %p42_p0  ;;  %s949_s27 = smov [#allocation6]  }
   0xb   : > { %s1238_s24 = scalar_select %p1017_p4, 1, 0 }
   0xc   : > { %s1239_s25 = scalar_select %p1022_p6, 1, 0 }
   0xd   : > { %p1027_p8 = pnand %p611_p5, %p163_p7  ;;  %s175_s28 = sshll.u32 %s949_s27, 4  ;;  %s1031_s28 = int_to_ptr.vmem [resolvable:$true] %s175_s28 }
   0xe   : > { %s950_s30 = smov [#allocation8]   ;;  %s791_s9 = scalar_lea.hbm %s1230_s1, 1024 }
   0xf   : > { %p714_p9 = pneg %p1027_p8  ;;  %s191_s6 = sshll.u32 %s950_s30, 4  ;;  %s1042_s6 = int_to_ptr.vmem [resolvable:$true] %s191_s6 }
  0x10   : > { %p792_p12 = scmp.ne.s32.totalorder %s1230_s1, %s791_s9  ;;  %p798_p5 = scmp.lt.u32.totalorder %s791_s9, %s1230_s1 }
  0x11   : > { %p1038_p11 = pnand %p714_p9, %p1235_p1 }
  0x13   : > { %p793_p13 = pneg %p1038_p11 }
  0x15   : > { %p794_p0 = pnand %p793_p13, %p792_p12 }
  0x17   : > { %p795_p3 = pneg %p794_p0 }
  0x19   : > { %p800_p7 = pnand %p798_p5, %p795_p3 }
  0x1b   : > { %803 = shalt.err (!%p800_p7)
}
  0x1c   : > { %s804_s14 = scalar_lea.vmem %s1031_s28, 1024  ;;  %p812_p2 = scmp.lt.s32.totalorder %s1031_s28, %s1031_s28 }
  0x1d   : > { %p805_p9 = scmp.ne.s32.totalorder %s1031_s28, %s804_s14  ;;  %p813_p12 = scmp.lt.s32.totalorder %s804_s14, %s804_s14 }
  0x1f   : > { %p807_p10 = pnand %p805_p9, %p793_p13  ;;  %p814_p0 = por %p813_p12, %p812_p2 }
  0x21   : > { %p808_p1 = pneg %p807_p10 }
  0x23   : > { %p815_p6 = pnand %p814_p0, %p808_p1 }
  0x25   : > { %818 = shalt.err (!%p815_p6)
}
  0x26   : > { %s951_s15 = smov 64   ;;  %s952_s16 = smov 4  }
  0x27   : > { %717 = dma.hbm_to_vmem [thread:$0]  (!%p1038_p11), %s1230_s1, 1024, %s1031_s28, [#allocation7], %s951_s15, %s951_s15, %s952_s16  }
  0x28   : > { %s819_s7 = scalar_lea.hbm %s1232_s3, 1024 }
  0x29   : > { %p820_p2 = scmp.ne.s32.totalorder %s1232_s3, %s819_s7  ;;  %p826_p10 = scmp.lt.u32.totalorder %s819_s7, %s1232_s3 }
  0x2b   : > { %p822_p1 = pnand %p820_p2, %p793_p13 }
  0x2d   : > { %p823_p6 = pneg %p822_p1 }
  0x2f   : > { %p828_p3 = pnand %p826_p10, %p823_p6 }
  0x31   : > { %831 = shalt.err (!%p828_p3)
}
  0x32   : > { %s832_s28 = scalar_lea.vmem %s1042_s6, 1024  ;;  %p840_p12 = scmp.lt.s32.totalorder %s1042_s6, %s1042_s6 }
  0x33   : > { %p833_p5 = scmp.ne.s32.totalorder %s1042_s6, %s832_s28  ;;  %p841_p0 = scmp.lt.s32.totalorder %s832_s28, %s832_s28 }
  0x35   : > { %p835_p7 = pnand %p833_p5, %p793_p13  ;;  %p842_p2 = por %p841_p0, %p840_p12 }
  0x37   : > { %p836_p9 = pneg %p835_p7 }
  0x39   : > { %p843_p1 = pnand %p842_p2, %p836_p9 }
  0x3b   : > { %846 = shalt.err (!%p843_p1)
}
  0x3c   : > { %720 = dma.hbm_to_vmem [thread:$0]  (!%p1038_p11), %s1232_s3, 1024, %s1042_s6, [#allocation7], %s951_s15, %s951_s15, %s952_s16  }
  0x3d   : > { %s1097_s14 = sadd.s32 1, %s947_s21   ;;  %s29_s29 = sadd.s32 1, %s943_s20 }
  0x3e   : > { %s26_s17 = ssub.s32 %s947_s21, %s1097_s14  ;;  %p36_p13 = scmp.ne.s32.totalorder %s943_s20, %s939_s19 }
  0x3f   : > { %p27_p6 = scmp.eq.s32.totalorder %s26_s17, 0  ;;  %p37_p10 = scmp.eq.s32.totalorder %s947_s21, 0 }
  0x40   : > { %p1242_p3 = scmp.eq.s32.totalorder %s1008_s22, 1  ;;  %p731_p7 = scmp.lt.s32.totalorder %s947_s21, 2 }
  0x41   : > { %s1113_s27 = scalar_select %p27_p6, %s943_s20, %s29_s29  }
  0x42   : > { %p1107_p5 = por %p1242_p3, %p36_p13  ;;  %p38_p9 = por %p37_p10, %p36_p13 }
  0x43   : > { %s208_s30 = sand.u32 1, %s943_s20   ;;  %s616_s6 = sshll.u32 %s947_s21, 7 }
  0x44   : > { %s1243_s23 = scalar_select %p1107_p5, 1, 0 }
  0x45   : > { %s615_s7 = sshll.u32 %s208_s30, 3  ;;  %s1120_s8 = scalar_lea.hbm %s1229_s0, %s616_s6 }
  0x46   : > { %s212_s9 = scalar_lea.vmem [#allocation3], %s615_s7  ;;  %p1124_p11 = pnand %p731_p7, %p38_p9 }
  0x47   : > { %s219_s10 = sshll.u32 %s212_s9, 4  ;;  %s209_s28 = scalar_lea.sflag [#allocation4], %s208_s30  ;;  %s1122_s10 = int_to_ptr.vmem [resolvable:$true] %s219_s10 }
  0x48   : > { %s847_s12 = scalar_lea.hbm %s1120_s8, 128  ;;  %p849_p0 = pneg %p1124_p11 }
  0x49   : > { %p848_p12 = scmp.ne.s32.totalorder %s1120_s8, %s847_s12  ;;  %s852_s17 = scalar_lea.hbm %s1229_s0, 256 }
  0x4a   : > { %p853_p13 = scmp.lt.u32.totalorder %s1120_s8, %s1229_s0  ;;  %p854_p6 = scmp.lt.u32.totalorder %s852_s17, %s847_s12 }
  0x4b   : > { %p850_p2 = pnand %p849_p0, %p848_p12  ;;  %p856_p3 = scmp.lt.u32.totalorder %s847_s12, %s1120_s8 }
  0x4c   : > { %p855_p10 = por %p854_p6, %p853_p13 }
  0x4d   : > { %p851_p1 = pneg %p850_p2 }
  0x4e   : > { %p857_p7 = por %p856_p3, %p855_p10 }
  0x50   : > { %p858_p9 = pnand %p857_p7, %p851_p1 }
  0x52   : > { %861 = shalt.err (!%p858_p9)
}
  0x53   : > { %s862_s30 = scalar_lea.vmem %s1122_s10, 128  ;;  %s953_s15 = smov [#allocation3]  }
  0x54   : > { %p863_p12 = scmp.ne.s32.totalorder %s1122_s10, %s862_s30  ;;  %s867_s16 = sshll.u32 %s953_s15, 4  ;;  %s868_s16 = int_to_ptr.vmem [resolvable:$false] %s867_s16 }
  0x55   : > { %s869_s9 = scalar_lea.vmem %s868_s16, 256  ;;  %p870_p4 = scmp.lt.s32.totalorder %s1122_s10, %s868_s16 }
  0x56   : > { %p865_p2 = pnand %p863_p12, %p849_p0  ;;  %p871_p13 = scmp.lt.s32.totalorder %s869_s9, %s862_s30 }
  0x58   : > { %p866_p5 = pneg %p865_p2  ;;  %p872_p6 = por %p871_p13, %p870_p4 }
  0x5a   : > { %p873_p10 = pnand %p872_p6, %p866_p5 }
  0x5c   : > { %876 = shalt.err (!%p873_p10)
}
  0x5d   : > { %724 = dma.hbm_to_vmem [thread:$0]  (!%p1124_p11), %s1120_s8, 128, %s1122_s10, %s209_s28  }
  0x5e   : > { %228 = sbr.rel (%p1027_p8) target bundleno = 600 (0x258), region = 40  ;;  %s1156_s12 = sand.u32 (!%p1027_p8), 1, %s939_s19  }
  0x5f   : > { %s618_s13 = sshll.u32 (!%p1027_p8), %s1156_s12, 3  ;;  %s231_s29 = scalar_lea.sflag (!%p1027_p8), [#allocation4], %s1156_s12 }
  0x60   : > { %s1162_s17 = scalar_lea.vmem (!%p1027_p8), [#allocation3], %s618_s13  ;;  %p1245_p4 = scmp.ne.s32.totalorder (!%p1027_p8), %s1238_s24, 0 }
  0x65   : > { %922 = dma.done.wait (%p1245_p4), %s231_s29, 128  }
  0x66   : > { %924 = vsyncadd (%p1245_p4), %s231_s29, 4294967168  ;;  %p1246_p5 = scmp.eq.s32.totalorder %s1008_s22, 0 }
  0x68   : > { %926 = dma.done.wait (%p1246_p5), [#allocation7], 2048   ;;  %p1247_p8 = pmov %p1246_p5 }
  0x69   : > { %v954_v0 = vmov 0.0   ;;  %vm955_vm0 = vmmov 0   ;;  %v773_v1 = vld [vmem:[#allocation6] sm:$0xff]   ;;  %v774_v2 = vld [vmem:[#allocation6 + $0x8] sm:$0xff]   ;;  %v775_v3 = vld [vmem:[#allocation6 + $0x10] sm:$0xff]   ;;  %s641_s11 = sshll.u32 %s1008_s22, 7 }
  0x6a   : > { %928 = vsyncadd (%p1247_p8), [#allocation7], 4294965248  ;;  %662 = vmatprep.subr.bf16.mxu0 %v954_v0  ;;  %678 = vmatprep.mubr.msk.bf16.mxu0 %vm955_vm0, %v954_v0  ;;  %v781_v4 = vld [vmem:[#allocation8] sm:$0xff]   ;;  %v776_v5 = vld [vmem:[#allocation6 + $0x18] sm:$0xff]   ;;  %s268_s28 = scalar_lea.vmem [#allocation9], %s618_s13  ;;  %s1185_s15 = scalar_lea.hbm %s1234_s5, %s641_s11 }
  0x6b   : > { %682 = vmatprep.subr.bf16.mxu1 %v954_v0  ;;  %698 = vmatprep.mubr.msk.bf16.mxu1 %vm955_vm0, %v954_v0  ;;  %v782_v6 = vld [vmem:[#allocation8 + $0x8] sm:$0xff]   ;;  %v777_v7 = vld [vmem:[#allocation6 + $0x20] sm:$0xff]   ;;  %v783_v8 = vld [vmem:[#allocation8 + $0x10] sm:$0xff]   ;;  %s521_s7 = sshll.u32 %s268_s28, 4  ;;  %s508_s22 = scalar_lea.sflag [#allocation5], %s1156_s12  ;;  %s1187_s7 = int_to_ptr.vmem [resolvable:$true] %s521_s7 }
  0x6c   : > { %663 = vmatpush3.bf16.msra.mxu0 %v773_v1  ;;  %683 = vmatpush3.bf16.msra.mxu1 %v781_v4  ;;  %v778_v9 = vld [vmem:[#allocation6 + $0x28] sm:$0xff]   ;;  %v779_v10 = vld [vmem:[#allocation6 + $0x30] sm:$0xff]   ;;  %v780_v11 = vld [vmem:[#allocation6 + $0x38] sm:$0xff]   ;;  %s877_s16 = scalar_lea.vmem %s1187_s7, 128  ;;  %p1248_p0 = scmp.ne.s32.totalorder %s1243_s23, 0 }
  0x6d   : > { %664 = vmatprep.subr.bf16.mxu0 %v954_v0  ;;  %684 = vmatprep.subr.bf16.mxu1 %v954_v0  ;;  %v270_v12 = vld [vmem:[%s1162_s17] sm:$0xff]  ;;  %v785_v15 = vld [vmem:[#allocation8 + $0x20] sm:$0xff]   ;;  %v786_v16 = vld [vmem:[#allocation8 + $0x28] sm:$0xff]   ;;  %p878_p11 = scmp.ne.s32.totalorder %s1187_s7, %s877_s16  ;;  %s956_s9 = smov [#allocation9]  }
  0x6e   : > { %v271_v13 = vpack.c.bf16 %v270_v12, %v270_v12  ;;  %v784_v14 = vld [vmem:[#allocation8 + $0x18] sm:$0xff]   ;;  %v787_v17 = vld [vmem:[#allocation8 + $0x30] sm:$0xff]   ;;  %s881_s13 = sshll.u32 %s956_s9, 4  ;;  %s882_s13 = int_to_ptr.vmem [resolvable:$false] %s881_s13 }
  0x6f   : > { %v788_v18 = vld [vmem:[#allocation8 + $0x38] sm:$0xff]   ;;  %v622_v19 = vld [vmem:[%s1231_s2] ss:$0 sm:$0xff]  ;;  %p879_p1 = pnand %p878_p11, %p1248_p0  ;;  %s883_s29 = scalar_lea.vmem %s882_s13, 256 }
  0x70   : > { %665 = vmatpush3.bf16.msra.mxu0 %v774_v2  ;;  %685 = vmatpush3.bf16.msra.mxu1 %v782_v6  ;;  %v639_v31 = vld [vmem:[%s1233_s4] ss:$0 sm:$0xff]  ;;  %p884_p7 = scmp.lt.s32.totalorder %s1187_s7, %s882_s13  ;;  %p885_p9 = scmp.lt.s32.totalorder %s883_s29, %s877_s16 }
  0x71   : > { %666 = vmatprep.subr.bf16.mxu0 %v954_v0  ;;  %686 = vmatprep.subr.bf16.mxu1 %v954_v0  ;;  %p880_p3 = pneg %p879_p1 }
  0x72   : > { %p886_p12 = por %p885_p9, %p884_p7 }
  0x74   : > { %667 = vmatpush3.bf16.msra.mxu0 %v775_v3  ;;  %687 = vmatpush3.bf16.msra.mxu1 %v783_v8  ;;  %p887_p2 = pnand %p886_p12, %p880_p3 }
  0x75   : > { %668 = vmatprep.subr.bf16.mxu0 %v954_v0  ;;  %688 = vmatprep.subr.bf16.mxu1 %v954_v0 }
  0x78   : > { %669 = vmatpush3.bf16.msra.mxu0 %v776_v5  ;;  %689 = vmatpush3.bf16.msra.mxu1 %v784_v14 }
  0x79   : > { %670 = vmatprep.subr.bf16.mxu0 %v954_v0  ;;  %690 = vmatprep.subr.bf16.mxu1 %v954_v0 }
  0x7c   : > { %671 = vmatpush3.bf16.msra.mxu0 %v777_v7  ;;  %691 = vmatpush3.bf16.msra.mxu1 %v785_v15 }
  0x7d   : > { %672 = vmatprep.subr.bf16.mxu0 %v954_v0  ;;  %692 = vmatprep.subr.bf16.mxu1 %v954_v0 }
  0x80   : > { %673 = vmatpush3.bf16.msra.mxu0 %v778_v9  ;;  %693 = vmatpush3.bf16.msra.mxu1 %v786_v16 }
  0x81   : > { %674 = vmatprep.subr.bf16.mxu0 %v954_v0  ;;  %694 = vmatprep.subr.bf16.mxu1 %v954_v0 }
  0x84   : > { %675 = vmatpush3.bf16.msra.mxu0 %v779_v10  ;;  %695 = vmatpush3.bf16.msra.mxu1 %v787_v17 }
  0x85   : > { %676 = vmatprep.subr.bf16.mxu0 %v954_v0  ;;  %696 = vmatprep.subr.bf16.mxu1 %v954_v0 }
  0x88   : > { %677 = vmatpush3.bf16.msra.mxu0 %v780_v11  ;;  %697 = vmatpush3.bf16.msra.mxu1 %v788_v18 }
  0x8b   : > { %679 = vmatmul.mubr.bf16.vlgmr.msra.gmra.mrb[0].mxu0 %v271_v13 }
 0x15e   : > { %v378_v20 = vpop.f32.mrb[0].mxu0 }
 0x15f   : > { %v379_v21 = vadd.f32 %v622_v19, %v378_v20  ;;  %v680_v22 = vpop.f32.mrb[1].mxu0 }
 0x160   : > { %v381_v23 = vpop.f32.mrb[2].mxu0 }
 0x161   : > { %v385_v24 = vmul.f32 0.70710677, %v379_v21  ;;  %v681_v25 = vpop.f32.mrb[3].mxu0  ;;  %v384_v27 = vmul.f32 0.5, %v379_v21 }
 0x163   : > { %789 = verf.f32 %v385_v24 }
 0x16d   : > { %v790_v26 = vpop.eup %789 }
 0x16e   : > { %v387_v28 = vadd.f32 1.0, %v790_v26 }
 0x170   : > { %v388_v29 = vmul.f32 %v387_v28, %v384_v27 }
 0x172   : > { %v390_v30 = vpack.c.bf16 %v388_v29, %v388_v29 }
 0x174   : > { %699 = vmatmul.mubr.bf16.vlgmr.msra.gmra.mrb[0].mxu1 %v390_v30 }
 0x247   : > { %v489_v32 = vpop.f32.mrb[0].mxu1 }
 0x248   : > { %v505_v33 = vadd.f32 %v639_v31, %v489_v32  ;;  %v700_v34 = vpop.f32.mrb[1].mxu1 }
 0x249   : > { %v492_v35 = vpop.f32.mrb[2].mxu1 }
 0x24a   : > { %506 = vst [vmem:[%s268_s28] sm:$0xff] %v505_v33  ;;  %v701_v36 = vpop.f32.mrb[3].mxu1 }
 0x24b   : > { %890 = shalt.err (!%p887_p2)
}
 0x24c   : > { %s891_s12 = scalar_lea.hbm %s1185_s15, 128  ;;  %s895_s26 = scalar_lea.hbm %s1234_s5, 256 }
 0x24d   : > { %p892_p13 = scmp.ne.s32.totalorder %s1185_s15, %s891_s12  ;;  %p896_p4 = scmp.lt.u32.totalorder %s1185_s15, %s1234_s5 }
 0x24e   : > { %p897_p5 = scmp.lt.u32.totalorder %s895_s26, %s891_s12  ;;  %p899_p11 = scmp.lt.u32.totalorder %s891_s12, %s1185_s15 }
 0x24f   : > { %p893_p6 = pnand %p892_p13, %p1248_p0 }
 0x250   : > { %p898_p8 = por %p897_p5, %p896_p4 }
 0x251   : > { %p894_p10 = pneg %p893_p6 }
 0x252   : > { %p900_p1 = por %p899_p11, %p898_p8 }
 0x254   : > { %p901_p3 = pnand %p900_p1, %p894_p10 }
 0x256   : > { %904 = shalt.err (!%p901_p3)
}
 0x257   : > { %712 = dma.vmem_to_hbm [thread:$0]  (%p1248_p0), %s1187_s7, 128, %s1185_s15, %s508_s22  }
 0x258 PF: > { %s533_s11 = sand.u32 1, %s935_s18   ;;  %p1249_p7 = scmp.ne.s32.totalorder %s1239_s25, 0 }
 0x259   : > { %p1250_p9 = scmp.ge.s32.totalorder %s947_s21, 2  ;;  %s534_s28 = scalar_lea.sflag [#allocation5], %s533_s11 }
 0x25b   : > { %p726_p12 = pnand %p1250_p9, %p1249_p7 }
 0x25d   : > { %930 = dma.done.wait (!%p726_p12), %s534_s28, 128  }
 0x25e   : > { %932 = vsyncadd (!%p726_p12), %s534_s28, 4294967168  ;;  %p19_p2 = scmp.ge.s32.totalorder %s1097_s14, 4   ;;  %s1251_s18 = smov %s939_s19 }
 0x25f   : > { %s1252_s19 = smov %s943_s20  ;;  %s1253_s20 = smov %s1113_s27 }
 0x260   : > { %s1254_s21 = smov %s1097_s14  ;;  %21 = sbr.rel (!%p19_p2) target bundleno = 6 (0x6), region = 93 }
 0x267   :  { %539 = vsyncpa [#allocation4], 1 }
 0x268   :  { %541 = vsyncpa [#allocation4 + $0x1], 1 }
 0x269   :  { %542 = vsyncpa [#allocation7], 1 }
 0x26a   :  { %543 = vsyncpa [#allocation5], 1 }
 0x26b   :  { %545 = vsyncpa [#allocation5 + $0x1], 1 }

</bundles_post_ra>
